<compile_context>
chip_gen: v6e
topology: v6e:2x2x1
jax: 0.10.0
libtpu: 0.0.40
codegen_flags: <defaults>
</compile_context>

<pallas_src>
import jax
import jax.numpy as jnp
from jax.experimental import pallas as pl
from jax.experimental.pallas import tpu as pltpu


_MASK_FILL = -1e9          # matches torch masked_fill value in the reference
_LANE = 128
_SUBLANE = 8


# ----------------------------------------------------------------------------
# Kernel body
# ----------------------------------------------------------------------------
def _attention_pooling_kernel(hs_ref, bias_ref, w_ref, out_ref,
                              m_ref, l_ref, acc_ref):
    s_step = pl.program_id(1)

    @pl.when(s_step == 0)
    def _init():
        m_ref[...] = jnp.full(m_ref.shape, -jnp.inf, dtype=m_ref.dtype)
        l_ref[...] = jnp.zeros(l_ref.shape, dtype=l_ref.dtype)
        acc_ref[...] = jnp.zeros(acc_ref.shape, dtype=acc_ref.dtype)

    hs = hs_ref[...]                                   # (bt, st, H), native dtype

    # Linear(H, 1) scores on the MXU.  Same operand orientation as the
    # flash-attention QK^T einsum (hs plays the K role -> no per-step relayout
    # of the big hs tile); the weight row is already (bt, 1, H) in hs dtype.
    scores = jnp.einsum('bqh,bsh->bqs', w_ref[...], hs,
                        preferred_element_type=jnp.float32)      # (bt, 1, st)
    # Additive mask bias (0 keep / -1e9 pad), prebaked in the wrapper.
    scores = scores + bias_ref[...]

    # ---- online softmax over the tiled sequence axis -----------------------
    m_prev = m_ref[...]                                           # (bt, 1, 1)
    m_new = jnp.maximum(m_prev, jnp.max(scores, axis=-1, keepdims=True))
    alpha = jnp.exp(m_prev - m_new)
    p = jnp.exp(scores - m_new)                                   # (bt, 1, st)
    l_ref[...] = alpha * l_ref[...] + jnp.sum(p, axis=-1, keepdims=True)

    # Weighted sum over the sequence tile (flash PV pattern, MXU).
    ctx = jnp.einsum('bqs,bsh->bqh', p.astype(hs.dtype), hs,
                     preferred_element_type=jnp.float32)          # (bt, 1, H)
    acc_ref[...] = alpha * acc_ref[...] + ctx
    m_ref[...] = m_new

    @pl.when(s_step == pl.num_programs(1) - 1)
    def _finalize():
        # Exact divide: runs once per batch tile, so the approximate EUP
        # reciprocal saves nothing and was removed (review feedback).
        out_ref[...] = (acc_ref[...] / l_ref[...]).astype(out_ref.dtype)


# ----------------------------------------------------------------------------
# Resource sizing
# ----------------------------------------------------------------------------
def _vmem_capacity_bytes():
    try:
        return int(pltpu.get_tpu_info().vmem_capacity_bytes)
    except Exception:
        return 64 * 1024 * 1024          # assume the smallest (v7x) per-core VMEM


def _largest_divisor_at_most(n, cap):
    cap = max(1, min(n, cap))
    for d in range(cap, 0, -1):
        if n % d == 0:
            return d
    return 1


def _vmem_estimate(bt, st, H, hs_bytes, out_bytes):
    """Resident VMEM for one pipelined grid step (double-buffered inputs)."""
    hs_buf = 2 * bt * st * H * hs_bytes                      # hidden_states stream
    bias_buf = 2 * bt * _SUBLANE * st * 4                    # additive mask bias
    w_buf = 2 * bt * _SUBLANE * H * hs_bytes                 # weight row (constant)
    out_buf = 2 * bt * _SUBLANE * H * out_bytes              # pooled output
    acc_buf = bt * _SUBLANE * H * 4 + 2 * bt * _SUBLANE * 4  # acc + m/l scratch
    slack = 4 * 1024 * 1024                                  # temporaries / spills
    return hs_buf + bias_buf + w_buf + out_buf + acc_buf + slack


def _select_tiles(B, S, H, hs_bytes, out_bytes, budget):
    # Batch tile: <= 8 rows, and <= B//2 so the "parallel" grid axis has at
    # least two steps and v7x can use both TensorCores (no cost on v5e/v6e).
    cap = min(8, B)
    if B >= 2:
        cap = min(cap, B // 2)
    bt = _largest_divisor_at_most(B, cap)

    # Sequence tile: target ~8 MiB hidden_states DMA tiles (HBM-roofline
    # territory), shrunk until the double-buffered working set fits `budget`.
    # TODO(synk): tile H as well for extremely large hidden sizes.
    st = max(_SUBLANE, (8 * 1024 * 1024) // (bt * H * hs_bytes))
    while st > _LANE and _vmem_estimate(bt, st, H, hs_bytes, out_bytes) > budget:
        st //= 2

    if st >= S:
        st, s_pad = S, S                 # single step: block dims == array dims
    else:
        st = max(_LANE, (st // _LANE) * _LANE)   # mask block needs a 128-multiple
        s_pad = ((S + st - 1) // st) * st        # pad S instead of whole-seq fallback
    return bt, st, s_pad


# ----------------------------------------------------------------------------
# Wrapper
# ----------------------------------------------------------------------------
def attention_pooling(hidden_states, attention_mask, w, b=None):
    """hidden_states: [B, S, H]; attention_mask: [B, S] (1 keep / 0 pad);
    w: [1, H], b: [1, 1] (nn.Linear(hidden, 1) params)  ->  [B, H].

    The Linear bias `b` is accepted for drop-in compatibility but unused:
    softmax is shift-invariant, so adding a scalar to every score cannot
    change the output."""
    del b
    B, S, H = hidden_states.shape
    hs_dtype = hidden_states.dtype
    hs_bytes = jnp.dtype(hs_dtype).itemsize
    out_bytes = hs_bytes

    vmem_cap = _vmem_capacity_bytes()
    budget = min(int(0.70 * vmem_cap), 96 * 1024 * 1024)
    bt, st, s_pad = _select_tiles(B, S, H, hs_bytes, out_bytes, budget)
    est = _vmem_estimate(bt, st, H, hs_bytes, out_bytes)
    vmem_limit = int(min(max(est, 32 * 1024 * 1024), int(0.90 * vmem_cap)))

    # ---- wrapper-side layout plumbing (cheap XLA ops) -----------------------
    bias = jnp.where(attention_mask == 0,
                     jnp.float32(_MASK_FILL), jnp.float32(0.0)).reshape(B, 1, S)
    w_row = jnp.broadcast_to(jnp.asarray(w).reshape(1, 1, H),
                             (bt, 1, H)).astype(hs_dtype)
    hs = hidden_states
    if s_pad != S:
        hs = jnp.pad(hs, ((0, 0), (0, s_pad - S), (0, 0)))
        bias = jnp.pad(bias, ((0, 0), (0, 0), (0, s_pad - S)),
                       constant_values=_MASK_FILL)

    grid = (B // bt, s_pad // st)
    out = pl.pallas_call(
        _attention_pooling_kernel,
        out_shape=jax.ShapeDtypeStruct((B, 1, H), hs_dtype),
        grid_spec=pltpu.PrefetchScalarGridSpec(
            num_scalar_prefetch=0,
            grid=grid,
            in_specs=[
                pl.BlockSpec((bt, st, H), lambda i, j: (i, j, 0)),   # hidden_states
                pl.BlockSpec((bt, 1, st), lambda i, j: (i, 0, j)),   # mask bias
                pl.BlockSpec((bt, 1, H), lambda i, j: (0, 0, 0)),    # weight row
            ],
            out_specs=pl.BlockSpec((bt, 1, H), lambda i, j: (i, 0, 0)),
            scratch_shapes=[
                pltpu.VMEM((bt, 1, 1), jnp.float32),   # running max m
                pltpu.VMEM((bt, 1, 1), jnp.float32),   # running sum l
                pltpu.VMEM((bt, 1, H), jnp.float32),   # running weighted acc
            ],
        ),
        compiler_params=pltpu.CompilerParams(
            dimension_semantics=("parallel", "arbitrary"),
            vmem_limit_bytes=vmem_limit,
        ),
    )(hs, bias, w_row)
    return out.reshape(B, H)


# ----------------------------------------------------------------------------
# Reference + self-test
# ----------------------------------------------------------------------------
def _reference(hidden_states, attention_mask, w, b):
    scores = jnp.einsum("bsh,h->bs", hidden_states, w[0]) + b[0, 0]
    scores = jnp.where(attention_mask == 0, _MASK_FILL, scores)
    attn = jax.nn.softmax(scores, axis=1)
    return jnp.sum(hidden_states * attn[:, :, None], axis=1)


if __name__ == "__main__":
    B, S, H = 2, 8, 32

    key = jax.random.PRNGKey(0)
    k_hs, k_w, k_b = jax.random.split(key, 3)

    hidden_states = jax.random.normal(k_hs, (B, S, H), dtype=jnp.float32)

    # mask: first batch fully valid, second batch padded after position 5
    lengths = jnp.array([S, 5], dtype=jnp.int32)
    attention_mask = (jnp.arange(S)[None, :] < lengths[:, None]).astype(jnp.int32)

    # nn.Linear(hidden_size, 1) parameters, deterministic init
    w = jax.random.normal(k_w, (1, H), dtype=jnp.float32) / jnp.sqrt(H)
    b = jax.random.normal(k_b, (1, 1), dtype=jnp.float32) * 0.01

    out = attention_pooling(hidden_states, attention_mask, w, b)
    out = jax.block_until_ready(out)

    ref = _reference(hidden_states, attention_mask, w, b)
    assert out.shape == (B, H)
    # Approx reciprocal and the lossy p cast were removed; the remaining
    # tolerance only covers MXU rounding of the f32 contractions.
    assert jnp.allclose(out, ref, atol=5e-3, rtol=5e-3), (out, ref)

    print("KERNEL_OK")
</pallas_src>

<mosaic_0001>
module attributes {stable_mosaic.version = 11 : i64} {
  func.func @_attention_pooling_kernel(%arg0: i32, %arg1: i32, %arg2: memref<1x8x32xf32, #tpu.memory_space<vmem>>, %arg3: memref<1x1x8xf32, #tpu.memory_space<vmem>>, %arg4: memref<1x1x32xf32, #tpu.memory_space<vmem>>, %arg5: memref<1x1x32xf32, #tpu.memory_space<vmem>>, %arg6: memref<1x1x1xf32, #tpu.memory_space<vmem>>, %arg7: memref<1x1x1xf32, #tpu.memory_space<vmem>>, %arg8: memref<1x1x32xf32, #tpu.memory_space<vmem>>) attributes {dimension_semantics = [#tpu.dimension_semantics<parallel>, #tpu.dimension_semantics<arbitrary>], iteration_bounds = array<i64: 2, 1>, scalar_prefetch = 0 : i64, scratch_operands = 3 : i64, tpu.core_type = #tpu.core_type<tc>, window_params = [{transform_indices = @transform_0, window_bounds = array<i64: 1, 8, 32>}, {transform_indices = @transform_1, window_bounds = array<i64: 1, 1, 8>}, {pipeline_mode = #tpu.pipeline_mode<synchronous>, transform_indices = @transform_2, window_bounds = array<i64: 1, 1, 32>}, {transform_indices = @transform_3, window_bounds = array<i64: 1, 1, 32>}]} {
    %c0_i32 = arith.constant 0 : i32
    %0 = arith.cmpi eq, %arg1, %c0_i32 : i32
    %1 = arith.extui %0 : i1 to i32
    %c0_i32_0 = arith.constant 0 : i32
    %2 = arith.cmpi ne, %1, %c0_i32_0 : i32
    scf.if %2 {
      %cst_32 = arith.constant 0xFF800000 : f32
      %33 = vector.broadcast %cst_32 : f32 to vector<1x1x1xf32>
      %c0_33 = arith.constant 0 : index
      %c0_34 = arith.constant 0 : index
      %c0_35 = arith.constant 0 : index
      %34 = vector.load %arg6[%c0_33, %c0_34, %c0_35] : memref<1x1x1xf32, #tpu.memory_space<vmem>>, vector<1x1x1xf32>
      tpu.vector_store %arg6[%c0_33, %c0_34, %c0_35], %33 {strides = array<i32>} : memref<1x1x1xf32, #tpu.memory_space<vmem>>, vector<1x1x1xf32>,
      %cst_36 = arith.constant 0.000000e+00 : f32
      %35 = vector.broadcast %cst_36 : f32 to vector<1x1x1xf32>
      %c0_37 = arith.constant 0 : index
      %c0_38 = arith.constant 0 : index
      %c0_39 = arith.constant 0 : index
      %36 = vector.load %arg7[%c0_37, %c0_38, %c0_39] : memref<1x1x1xf32, #tpu.memory_space<vmem>>, vector<1x1x1xf32>
      tpu.vector_store %arg7[%c0_37, %c0_38, %c0_39], %35 {strides = array<i32>} : memref<1x1x1xf32, #tpu.memory_space<vmem>>, vector<1x1x1xf32>,
      %cst_40 = arith.constant 0.000000e+00 : f32
      %37 = vector.broadcast %cst_40 : f32 to vector<1x1x32xf32>
      %c0_41 = arith.constant 0 : index
      %c0_42 = arith.constant 0 : index
      %c0_43 = arith.constant 0 : index
      %38 = vector.load %arg8[%c0_41, %c0_42, %c0_43] : memref<1x1x32xf32, #tpu.memory_space<vmem>>, vector<1x1x32xf32>
      tpu.vector_store %arg8[%c0_41, %c0_42, %c0_43], %37 {strides = array<i32>} : memref<1x1x32xf32, #tpu.memory_space<vmem>>, vector<1x1x32xf32>,
    } else {
    }
    %c0 = arith.constant 0 : index
    %c0_1 = arith.constant 0 : index
    %c0_2 = arith.constant 0 : index
    %3 = vector.load %arg2[%c0, %c0_1, %c0_2] : memref<1x8x32xf32, #tpu.memory_space<vmem>>, vector<1x8x32xf32>
    %c0_3 = arith.constant 0 : index
    %c0_4 = arith.constant 0 : index
    %c0_5 = arith.constant 0 : index
    %4 = vector.load %arg4[%c0_3, %c0_4, %c0_5] : memref<1x1x32xf32, #tpu.memory_space<vmem>>, vector<1x1x32xf32>
    "tpu.trace_start"() <{level = 10 : i32, message = "bqh,bsh->bqs"}> : () -> ()
    %cst = arith.constant dense<0.000000e+00> : vector<1x1x8xf32>
    %5 = tpu.matmul %4, %3, %cst {dimension_numbers = #tpu.dot_dimension_numbers<[2], [2], [1], [1], [0, 0, 0, 1, 1, 1], [0], [0]>} : vector<1x1x32xf32>, vector<1x8x32xf32>, vector<1x1x8xf32> -> vector<1x1x8xf32>
    "tpu.trace_stop"() : () -> ()
    %c0_6 = arith.constant 0 : index
    %c0_7 = arith.constant 0 : index
    %c0_8 = arith.constant 0 : index
    %6 = vector.load %arg3[%c0_6, %c0_7, %c0_8] : memref<1x1x8xf32, #tpu.memory_space<vmem>>, vector<1x1x8xf32>
    %7 = arith.addf %5, %6 : vector<1x1x8xf32>
    %c0_9 = arith.constant 0 : index
    %c0_10 = arith.constant 0 : index
    %c0_11 = arith.constant 0 : index
    %8 = vector.load %arg6[%c0_9, %c0_10, %c0_11] : memref<1x1x1xf32, #tpu.memory_space<vmem>>, vector<1x1x1xf32>
    %cst_12 = arith.constant dense<0xFF800000> : vector<1x1xf32>
    %9 = vector.multi_reduction <maximumf>, %7, %cst_12 [2] : vector<1x1x8xf32> to vector<1x1xf32>
    %10 = vector.shape_cast %9 : vector<1x1xf32> to vector<1x1x1xf32>
    %11 = arith.maximumf %8, %10 : vector<1x1x1xf32>
    %12 = arith.subf %8, %11 : vector<1x1x1xf32>
    %13 = math.exp %12 : vector<1x1x1xf32>
    %14 = vector.broadcast %11 : vector<1x1x1xf32> to vector<1x1x8xf32>
    %15 = arith.subf %7, %14 : vector<1x1x8xf32>
    %16 = math.exp %15 : vector<1x1x8xf32>
    %c0_13 = arith.constant 0 : index
    %c0_14 = arith.constant 0 : index
    %c0_15 = arith.constant 0 : index
    %17 = vector.load %arg7[%c0_13, %c0_14, %c0_15] : memref<1x1x1xf32, #tpu.memory_space<vmem>>, vector<1x1x1xf32>
    %18 = arith.mulf %13, %17 : vector<1x1x1xf32>
    %cst_16 = arith.constant dense<0.000000e+00> : vector<1x1xf32>
    %19 = vector.multi_reduction <add>, %16, %cst_16 [2] : vector<1x1x8xf32> to vector<1x1xf32>
    %20 = vector.shape_cast %19 : vector<1x1xf32> to vector<1x1x1xf32>
    %21 = arith.addf %18, %20 : vector<1x1x1xf32>
    %c0_17 = arith.constant 0 : index
    %c0_18 = arith.constant 0 : index
    %c0_19 = arith.constant 0 : index
    %22 = vector.load %arg7[%c0_17, %c0_18, %c0_19] : memref<1x1x1xf32, #tpu.memory_space<vmem>>, vector<1x1x1xf32>
    tpu.vector_store %arg7[%c0_17, %c0_18, %c0_19], %21 {strides = array<i32>} : memref<1x1x1xf32, #tpu.memory_space<vmem>>, vector<1x1x1xf32>,
    "tpu.trace_start"() <{level = 10 : i32, message = "bqs,bsh->bqh"}> : () -> ()
    %cst_20 = arith.constant dense<0.000000e+00> : vector<1x1x32xf32>
    %23 = tpu.matmul %16, %3, %cst_20 {dimension_numbers = #tpu.dot_dimension_numbers<[2], [1], [1], [2], [0, 0, 0, 1, 1, 2], [0], [0]>} : vector<1x1x8xf32>, vector<1x8x32xf32>, vector<1x1x32xf32> -> vector<1x1x32xf32>
    "tpu.trace_stop"() : () -> ()
    %c0_21 = arith.constant 0 : index
    %c0_22 = arith.constant 0 : index
    %c0_23 = arith.constant 0 : index
    %24 = vector.load %arg8[%c0_21, %c0_22, %c0_23] : memref<1x1x32xf32, #tpu.memory_space<vmem>>, vector<1x1x32xf32>
    %25 = vector.broadcast %13 : vector<1x1x1xf32> to vector<1x1x32xf32>
    %26 = arith.mulf %25, %24 : vector<1x1x32xf32>
    %27 = arith.addf %26, %23 : vector<1x1x32xf32>
    %c0_24 = arith.constant 0 : index
    %c0_25 = arith.constant 0 : index
    %c0_26 = arith.constant 0 : index
    %28 = vector.load %arg8[%c0_24, %c0_25, %c0_26] : memref<1x1x32xf32, #tpu.memory_space<vmem>>, vector<1x1x32xf32>
    tpu.vector_store %arg8[%c0_24, %c0_25, %c0_26], %27 {strides = array<i32>} : memref<1x1x32xf32, #tpu.memory_space<vmem>>, vector<1x1x32xf32>,
    %c0_27 = arith.constant 0 : index
    %c0_28 = arith.constant 0 : index
    %c0_29 = arith.constant 0 : index
    %29 = vector.load %arg6[%c0_27, %c0_28, %c0_29] : memref<1x1x1xf32, #tpu.memory_space<vmem>>, vector<1x1x1xf32>
    tpu.vector_store %arg6[%c0_27, %c0_28, %c0_29], %11 {strides = array<i32>} : memref<1x1x1xf32, #tpu.memory_space<vmem>>, vector<1x1x1xf32>,
    %c0_i32_30 = arith.constant 0 : i32
    %30 = arith.cmpi eq, %arg1, %c0_i32_30 : i32
    %31 = arith.extui %30 : i1 to i32
    %c0_i32_31 = arith.constant 0 : i32
    %32 = arith.cmpi ne, %31, %c0_i32_31 : i32
    scf.if %32 {
      %c0_32 = arith.constant 0 : index
      %c0_33 = arith.constant 0 : index
      %c0_34 = arith.constant 0 : index
      %33 = vector.load %arg8[%c0_32, %c0_33, %c0_34] : memref<1x1x32xf32, #tpu.memory_space<vmem>>, vector<1x1x32xf32>
      %c0_35 = arith.constant 0 : index
      %c0_36 = arith.constant 0 : index
      %c0_37 = arith.constant 0 : index
      %34 = vector.load %arg7[%c0_35, %c0_36, %c0_37] : memref<1x1x1xf32, #tpu.memory_space<vmem>>, vector<1x1x1xf32>
      %35 = vector.broadcast %34 : vector<1x1x1xf32> to vector<1x1x32xf32>
      %36 = arith.divf %33, %35 : vector<1x1x32xf32>
      %c0_38 = arith.constant 0 : index
      %c0_39 = arith.constant 0 : index
      %c0_40 = arith.constant 0 : index
      %37 = vector.load %arg5[%c0_38, %c0_39, %c0_40] : memref<1x1x32xf32, #tpu.memory_space<vmem>>, vector<1x1x32xf32>
      tpu.vector_store %arg5[%c0_38, %c0_39, %c0_40], %36 {strides = array<i32>} : memref<1x1x32xf32, #tpu.memory_space<vmem>>, vector<1x1x32xf32>,
    } else {
    }
    return
  }
  func.func @transform_0(%arg0: i32, %arg1: i32) -> (i32, i32, i32) {
    %c0_i32 = arith.constant 0 : i32
    %c0_i32_0 = arith.constant 0 : i32
    return %arg0, %arg1, %c0_i32 : i32, i32, i32
  }
  func.func @transform_1(%arg0: i32, %arg1: i32) -> (i32, i32, i32) {
    %c0_i32 = arith.constant 0 : i32
    %c0_i32_0 = arith.constant 0 : i32
    return %arg0, %c0_i32, %arg1 : i32, i32, i32
  }
  func.func @transform_2(%arg0: i32, %arg1: i32) -> (i32, i32, i32) {
    %c0_i32 = arith.constant 0 : i32
    %c0_i32_0 = arith.constant 0 : i32
    %c0_i32_1 = arith.constant 0 : i32
    %c0_i32_2 = arith.constant 0 : i32
    return %c0_i32, %c0_i32_0, %c0_i32_1 : i32, i32, i32
  }
  func.func @transform_3(%arg0: i32, %arg1: i32) -> (i32, i32, i32) {
    %c0_i32 = arith.constant 0 : i32
    %c0_i32_0 = arith.constant 0 : i32
    %c0_i32_1 = arith.constant 0 : i32
    return %arg0, %c0_i32, %c0_i32_0 : i32, i32, i32
  }
}

</mosaic_0001>

<bundles_post_ra>
// kernel: tpu_custom_call.1
= control target key start
LH: loop header
LB: loop body
LE: loop exit
PB: predicated region body
PF: predicated region fallthrough
CT: control target
= control target key end

     0   :  { %8 = vsyncpa [#allocation6], 0  ;;  %s1024_s0 = inlined_call_operand.hbm [shape: f32[2,8,32], index: 0, kind: input, shape index: {}]   ;;  %s1025_s1 = inlined_call_operand.hbm [shape: f32[2,1,8], index: 1, kind: input, shape index: {}]   ;;  %s1026_s2 = inlined_call_operand.vmem [shape: f32[1,1,32], index: 2, kind: input, shape index: {}]   ;;  %s1027_s3 = inlined_call_operand.hbm [shape: f32[2,1,32], index: 3, kind: output, shape index: {}]  }
   0x1   :  { %10 = vsyncpa [#allocation6 + $0x1], 0 }
   0x2   :  { %11 = vsyncpa [#allocation9], 0 }
   0x3   :  { %13 = vsyncpa [#allocation9 + $0x1], 0 }
   0x4   :  { %14 = vsyncpa [#allocation7], 0 }
   0x5   :  { %16 = vsyncpa [#allocation7 + $0x1], 0  ;;  %s847_s12 = smov 0   ;;  %s849_s13 = smov 0  }
   0x6   :  { %s851_s14 = smov 0   ;;  %s853_s15 = smov 0  }
   0x7   :  { %s855_s16 = smov 0   ;;  %s857_s17 = smov 0  }
   0x8 LB: > { %s570_s18 = sadd.s32 4294967295, %s818_s17   ;;  %s571_s19 = sadd.s32 4294967294, %s818_s17   ;;  %s818_s17 = sphi %s857_s17, %s22_s17   ;;  %s814_s16 = sphi %s855_s16, %s1039_s16   ;;  %s810_s15 = sphi %s853_s15, %s1038_s15   ;;  %s806_s14 = sphi %s851_s14, %s1037_s14   ;;  %s802_s13 = sphi %s849_s13, %s1036_s13   ;;  %s798_s12 = sphi %s847_s12, %s1035_s12  }
   0x9   : > { %s34_s20 = sadd.s32 1, %s814_s16  ;;  %s43_s21 = sadd.s32 1, %s806_s14 }
   0xa   : > { %p36_p0 = scmp.ge.s32.totalorder %s34_s20, 2  ;;  %p50_p1 = scmp.ne.s32.totalorder %s806_s14, %s802_s13 }
   0xb   : > { %p51_p2 = scmp.eq.s32.totalorder %s818_s17, 0  ;;  %p56_p3 = scmp.ne.s32.totalorder %s802_s13, %s798_s12 }
   0xc   : > { %s1041_s20 = smov (%p36_p0, %s34_s20), 0  ;;  %p57_p5 = scmp.eq.s32.totalorder %s570_s18, 0 }
   0xd   : > { %p888_p4 = por %p51_p2, %p50_p1  ;;  %s38_s23 = ssub.s32 %s814_s16, %s1041_s20 }
   0xe   : > { %p129_p6 = scmp.eq.s32.totalorder %s570_s18, 1  ;;  %p41_p7 = scmp.eq.s32.totalorder %s38_s23, 0 }
   0xf   : > { %p894_p8 = por %p57_p5, %p56_p3  ;;  %p135_p10 = scmp.eq.s32.totalorder %s571_s19, 1 }
  0x10   : > { %p898_p9 = por %p129_p6, %p50_p1  ;;  %p616_p13 = scmp.lt.s32.totalorder %s818_s17, 2 }
  0x11   : > { %s903_s26 = scalar_select %p41_p7, %s806_s14, %s43_s21  }
  0x12   : > { %p905_p11 = por %p135_p10, %p56_p3  ;;  %s912_s28 = sand.u32 1, %s806_s14  }
  0x13   : > { %s574_s29 = sshll.u32 %s912_s28, 3  ;;  %s575_s30 = sshll.u32 %s814_s16, 7 }
  0x14   : > { %s168_s6 = scalar_lea.hbm %s1024_s0, %s575_s30  ;;  %s162_s7 = scalar_lea.vmem [#allocation5], %s574_s29 }
  0x15   : > { %s170_s8 = sshll.u32 %s162_s7, 4  ;;  %p921_p0 = pnand %p616_p13, %p888_p4  ;;  %s171_s8 = int_to_ptr.vmem [resolvable:$true] %s170_s8 }
  0x16   : > { %p577_p1 = scmp.ge.s32.totalorder %s818_s17, 1  ;;  %p193_p2 = scmp.lt.s32.totalorder %s818_s17, 3 }
  0x17   : > { %s159_s10 = scalar_lea.sflag [#allocation6], %s912_s28  ;;  %p680_p3 = pneg %p921_p0 }
  0x18   : > { %s691_s11 = scalar_lea.vmem %s171_s8, 128  ;;  %s820_s18 = smov [#allocation5]  }
  0x19   : > { %p692_p5 = scmp.ne.s32.totalorder %s171_s8, %s691_s11  ;;  %s696_s19 = sshll.u32 %s820_s18, 4  ;;  %s697_s19 = int_to_ptr.vmem [resolvable:$false] %s696_s19 }
  0x1a   : > { %s698_s21 = scalar_lea.vmem %s697_s19, 256  ;;  %p699_p4 = scmp.lt.s32.totalorder %s171_s8, %s697_s19 }
  0x1b   : > { %p694_p6 = pnand %p692_p5, %p680_p3  ;;  %p700_p10 = scmp.lt.s32.totalorder %s698_s21, %s691_s11 }
  0x1d   : > { %p695_p7 = pneg %p694_p6  ;;  %p701_p13 = por %p700_p10, %p699_p4 }
  0x1f   : > { %p702_p12 = pnand %p701_p13, %p695_p7 }
  0x21   : > { %705 = shalt.err (!%p702_p12)
}
  0x22   : > { %608 = dma.hbm_to_vmem [thread:$0]  (!%p921_p0), %s168_s6, 128, %s171_s8, %s159_s10  }
  0x23   : > { %p939_p5 = pnand %p577_p1, %p193_p2  ;;  %s576_s23 = sshll.u32 %s814_s16, 4 }
  0x24   : > { %s180_s29 = scalar_lea.vmem [#allocation8], %s912_s28  ;;  %s186_s7 = scalar_lea.hbm %s1025_s1, %s576_s23 }
  0x25   : > { %s188_s30 = sshll.u32 %s180_s29, 4  ;;  %s178_s11 = scalar_lea.sflag [#allocation9], %s912_s28  ;;  %s189_s30 = int_to_ptr.vmem [resolvable:$true] %s188_s30 }
  0x26   : > { %s719_s18 = scalar_lea.vmem %s189_s30, 16  ;;  %s821_s6 = smov [#allocation8]  }
  0x27   : > { %p720_p12 = scmp.ne.s32.totalorder %s189_s30, %s719_s18  ;;  %s724_s8 = sshll.u32 %s821_s6, 4  ;;  %s725_s8 = int_to_ptr.vmem [resolvable:$false] %s724_s8 }
  0x28   : > { %s726_s10 = scalar_lea.vmem %s725_s8, 32  ;;  %p727_p1 = scmp.lt.s32.totalorder %s189_s30, %s725_s8 }
  0x29   : > { %p722_p6 = pnand %p720_p12, %p680_p3  ;;  %p728_p2 = scmp.lt.s32.totalorder %s726_s10, %s719_s18 }
  0x2b   : > { %p723_p7 = pneg %p722_p6  ;;  %p729_p4 = por %p728_p2, %p727_p1 }
  0x2d   : > { %p730_p10 = pnand %p729_p4, %p723_p7 }
  0x2f   : > { %733 = shalt.err (!%p730_p10)
}
  0x30   : > { %611 = dma.hbm_to_vmem [thread:$0]  (!%p921_p0), %s186_s7, 16, %s189_s30, %s178_s11  }
  0x31   : > { %197 = sbr.rel (%p939_p5) target bundleno = 849 (0x351), region = 32  ;;  %s957_s28 = sand.u32 (!%p939_p5), 1, %s802_s13  }
  0x32   : > { %s578_s19 = sshll.u32 (!%p939_p5), %s957_s28, 3  ;;  %s200_s21 = scalar_lea.sflag (!%p939_p5), [#allocation6], %s957_s28 }
  0x33   : > { %s203_s23 = scalar_lea.vmem (!%p939_p5), [#allocation5], %s578_s19 }
  0x36   : > { %785 = dma.done.wait (%p894_p8), %s200_s21, 128  }
  0x37   : > { %787 = vsyncadd (%p894_p8), %s200_s21, 4294967168  ;;  %s209_s9 = scalar_lea.sflag [#allocation9], %s957_s28  ;;  %s211_s22 = scalar_lea.vmem [#allocation8], %s957_s28 }
  0x38   : > { %789 = dma.done.wait (%p894_p8), %s209_s9, 16  }
  0x39   : > { %791 = vsyncadd (%p894_p8), %s209_s9, 4294967280  ;;  %v822_v0 = vmov 0.0   ;;  %vm823_vm0 = vmmov 0   ;;  %vm249_vm1 = vcmask 261120   ;;  %v246_v1 = vld [vmem:[%s203_s23] sm:$0xff]  ;;  %vm241_vm2 = vcmask 0  }
  0x3a   : > { %589 = vmatprep.subr.mxu0 %v822_v0  ;;  %591 = vmatprep.mubr.msk.f32.mxu0 %vm823_vm0, %v822_v0  ;;  %v247_v2 = vld [vmem:[%s1026_s2] sm:$0x1]  ;;  %v824_v3 = vmov -inf   ;;  %243 = vst.msk [vmem:[#allocation3] sm:$0x1] %vm241_vm2, %v822_v0  ;;  %vm327_vm3 = vcmask 57344   ;;  %v340_v14 = vlaneseq }
  0x3b   : > { %594 = vmatprep.subr.mxu1 %v822_v0  ;;  %596 = vmatprep.mubr.msk.f32.mxu1 %vm823_vm0, %v822_v0  ;;  %242 = vst.msk [vmem:[#allocation2] sm:$0x1] %vm241_vm2, %v824_v3  ;;  %v248_v4 = vld [vmem:[%s211_s22] sm:$0x1]  ;;  %v825_v9 = vmov 0   ;;  %vm355_vm4 = vcmask 64512  }
  0x3c   : > { %590 = vmatpush3.xpose.msk.msra.mxu0 %vm249_vm1, %v246_v1  ;;  %595 = vmatpush3.msra.mxu1 %v246_v1  ;;  %v341_v15 = vshrl.u32 %v340_v14, 7  ;;  %vm244_vm5 = vcmask 253952   ;;  %s582_s24 = sshll.u32 %s810_s15, 4  ;;  %s236_s4 = scalar_lea.vmem [#allocation10], %s957_s28 }
  0x3d   : > { %670 = vset.pattern.permute.xlu0 %v825_v9  ;;  %671 = vset.pattern.permute.xlu1 %v825_v9  ;;  %245 = vst.msk [vmem:[#allocation4] sm:$0x1] %vm244_vm5, %v822_v0  ;;  %s474_s5 = sshll.u32 %s236_s4, 4  ;;  %s472_s18 = scalar_lea.hbm %s1027_s3, %s582_s24  ;;  %s475_s5 = int_to_ptr.vmem [resolvable:$true] %s474_s5 }
  0x3e   : > { %v342_v16 = vsub.s32 0, %v341_v15  ;;  %s462_s6 = scalar_lea.sflag [#allocation7], %s957_s28  ;;  %s734_s8 = scalar_lea.vmem %s475_s5, 16 }
  0x3f   : > { %592 = vmatmul.mubr.msk.f32.vlgmr.msra.gmra.mxu0 %vm249_vm1, %v247_v2  ;;  %p735_p8 = scmp.ne.s32.totalorder %s475_s5, %s734_s8  ;;  %s826_s10 = smov [#allocation10]  }
  0x40   : > { %s738_s15 = sshll.u32 %s826_s10, 4  ;;  %s739_s15 = int_to_ptr.vmem [resolvable:$false] %s738_s15 }
  0x41   : > { %v347_v25 = vld [vmem:[#allocation3] sm:$0x1]  ;;  %p736_p0 = pnand %p735_p8, %p898_p9  ;;  %s740_s19 = scalar_lea.vmem %s739_s15, 32 }
  0x42   : > { %v326_v10 = vld [vmem:[#allocation2] sm:$0x1]  ;;  %p741_p13 = scmp.lt.s32.totalorder %s475_s5, %s739_s15  ;;  %p742_p5 = scmp.lt.s32.totalorder %s740_s19, %s734_s8 }
  0x43   : > { %p737_p3 = pneg %p736_p0 }
  0x44   : > { %v429_v34 = vld [vmem:[#allocation4] sm:$0x1]  ;;  %p743_p12 = por %p742_p5, %p741_p13 }
  0x46   : > { %p744_p6 = pnand %p743_p12, %p737_p3 }
  0xff   : > { %v322_v5 = vpop.f32.mrf.mxu0 }
 0x100   : > { %v323_v6 = vadd.f32 %v322_v5, %v248_v4 }
 0x101   : > { %v593_v7 = vpop.f32.mrf.mxu0 }
 0x102   : > { %v328_v8 = vsel %vm327_vm3, %v323_v6, -inf }
 0x103   : > { %329 = vmax.xlane.f32.xlu0 %v328_v8 }
 0x18c   : > { %v330_v11 = vpop.xlane.xlu0 %329 }
 0x18d   : > { %v331_v12 = vmax.f32 %v326_v10, %v330_v11 }
 0x18f   : > { %v332_v13 = vsub.f32 %v326_v10, %v331_v12  ;;  %443 = vst.msk [vmem:[#allocation2] sm:$0x1] %vm241_vm2, %v331_v12  ;;  %337 = vperm.xlu0 %670, %v331_v12  }
 0x191   : > { %v333_v23 = vmul.f32 1.442695, %v332_v13 }
 0x20a   : > { %v338_v17 = vpop.permute.xlu0 %337 }
 0x20b   : > { %v343_v18 = vrot.slane %v338_v17, %v342_v16 }
 0x20d   : > { %v344_v19 = vsub.f32 %v323_v6, %v343_v18 }
 0x20f   : > { %v345_v20 = vmul.f32 1.442695, %v344_v19 }
 0x211   : > { %672 = vpow2.f32 %v345_v20 }
 0x212   : > { %674 = vpow2.f32 %v333_v23 }
 0x21e   : > { %v673_v21 = vpop.eup %672 }
 0x21f   : > { %597 = vmatmul.mubr.msk.f32.vlgmr.msra.gmra.mxu1 %vm355_vm4, %v673_v21  ;;  %v349_v22 = vsel %vm327_vm3, %v673_v21, 0.0  ;;  %v675_v24 = vpop.eup %674 }
 0x220   : > { %350 = vadd.xlane.f32.xlu1 %v349_v22  ;;  %v348_v26 = vmul.f32 %v675_v24, %v347_v25 }
 0x2a9   : > { %v351_v27 = vpop.xlane.xlu1 %350 }
 0x2aa   : > { %v352_v28 = vadd.f32 %v351_v27, %v348_v26 }
 0x2ac   : > { %354 = vst.msk [vmem:[#allocation3] sm:$0x1] %vm241_vm2, %v352_v28 }
 0x2b3   : > { %v448_v29 = vld [vmem:[#allocation3] sm:$0x1] }
 0x2b4   : > { %451 = vperm.xlu1 %671, %v448_v29  }
 0x2b8   : > { %432 = vperm.xlu1 %671, %v675_v24  }
 0x2df   : > { %v425_v30 = vpop.f32.mrf.mxu1 }
 0x2e1   : > { %v598_v31 = vpop.f32.mrf.mxu1 }
 0x32f   : > { %v452_v32 = vpop.permute.xlu1 %451 }
 0x330   : > { %v457_v33 = vrot.slane %v452_v32, %v342_v16 }
 0x332   : > { %676 = vrcp.f32 %v457_v33 }
 0x333   : > { %v433_v35 = vpop.permute.xlu1 %432 }
 0x334   : > { %v438_v36 = vrot.slane %v433_v35, %v342_v16 }
 0x336   : > { %v439_v37 = vmul.f32 %v438_v36, %v429_v34 }
 0x338   : > { %v440_v38 = vadd.f32 %v439_v37, %v425_v30 }
 0x33a   : > { %442 = vst.msk [vmem:[#allocation4] sm:$0x1] %vm244_vm5, %v440_v38 }
 0x33f   : > { %v677_v39 = vpop.eup %676 }
 0x341   : > { %v447_v40 = vld [vmem:[#allocation4] sm:$0x1] }
 0x342   : > { %v459_v41 = vmul.f32 %v677_v39, %v447_v40 }
 0x344   : > { %460 = vst.msk [vmem:[%s236_s4] sm:$0x1] %vm244_vm5, %v459_v41 }
 0x345   : > { %747 = shalt.err (!%p744_p6)
}
 0x346   : > { %s748_s21 = scalar_lea.hbm %s472_s18, 16  ;;  %s752_s9 = scalar_lea.hbm %s1027_s3, 32 }
 0x347   : > { %p749_p7 = scmp.ne.s32.totalorder %s472_s18, %s748_s21  ;;  %p753_p4 = scmp.lt.s32.totalorder %s472_s18, %s1027_s3 }
 0x348   : > { %p754_p10 = scmp.lt.s32.totalorder %s752_s9, %s748_s21 }
 0x349   : > { %p750_p1 = pnand %p749_p7, %p898_p9 }
 0x34a   : > { %p755_p8 = por %p754_p10, %p753_p4 }
 0x34b   : > { %p751_p2 = pneg %p750_p1 }
 0x34d   : > { %p756_p0 = pnand %p755_p8, %p751_p2 }
 0x34f   : > { %759 = shalt.err (!%p756_p0)
}
 0x350   : > { %603 = dma.vmem_to_hbm [thread:$0]  (%p898_p9), %s475_s5, 16, %s472_s18, %s462_s6  }
 0x351 PF: > { %s486_s30 = sand.u32 1, %s798_s12   ;;  %p1034_p3 = scmp.ge.s32.totalorder %s818_s17, 2 }
 0x352   : > { %s487_s24 = scalar_lea.sflag [#allocation7], %s486_s30 }
 0x353   : > { %p613_p13 = pnand %p1034_p3, %p905_p11 }
 0x355   : > { %p614_p5 = pneg %p613_p13 }
 0x357   : > { %793 = dma.done.wait (%p614_p5), %s487_s24, 16  }
 0x358   : > { %795 = vsyncadd (%p614_p5), %s487_s24, 4294967280  ;;  %s22_s17 = sadd.s32 1, %s818_s17   ;;  %s1035_s12 = smov %s802_s13 }
 0x359   : > { %p19_p12 = scmp.ge.s32.totalorder %s22_s17, 4   ;;  %s1036_s13 = smov %s806_s14 }
 0x35a   : > { %s1037_s14 = smov %s903_s26  ;;  %s1038_s15 = smov %s814_s16 }
 0x35b   : > { %s1039_s16 = smov %s1041_s20  ;;  %21 = sbr.rel (!%p19_p12) target bundleno = 8 (0x8), region = 98 }
 0x360   :  { %491 = vsyncpa [#allocation6], 1 }
 0x361   :  { %493 = vsyncpa [#allocation6 + $0x1], 1 }
 0x362   :  { %494 = vsyncpa [#allocation9], 1 }
 0x363   :  { %496 = vsyncpa [#allocation9 + $0x1], 1 }
 0x364   :  { %497 = vsyncpa [#allocation7], 1 }
 0x365   :  { %499 = vsyncpa [#allocation7 + $0x1], 1 }

</bundles_post_ra>
